<compile_context>
chip_gen: v6e
topology: v6e:2x2x1
jax: 0.10.0
libtpu: 0.0.40
codegen_flags: <defaults>
</compile_context>

<pallas_src>
import jax
import jax.numpy as jnp
from jax.experimental import pallas as pl
from jax.experimental.pallas import tpu as pltpu

LANE = 128     # vreg lane width (last dim)
SUBLANE = 8    # vreg sublane width (second-to-last dim)


def _round_up(x, m):
    return ((x + m - 1) // m) * m


def mlp_kernel(x_ref, w1_ref, b1_ref, w2_ref, b2_ref, o_ref):
    # x_ref:  (TB, D)  f32   -- streamed batch tile (cast to bf16 here; cheap VPU work)
    # w1_ref: (D, Hp)  bf16  -- resident across the batch grid (Buffered(1))
    # b1_ref: (1, Hp)  f32
    # w2_ref: (Hp, Cp) bf16  -- resident (Buffered(1))
    # b2_ref: (1, Cp)  f32
    # o_ref:  (TB, Cp) f32   -- lane-dense (Cp is a multiple of 128)
    x = x_ref[...].astype(jnp.bfloat16)
    h = jnp.dot(x, w1_ref[...], preferred_element_type=jnp.float32)
    # Keep the elementwise epilogue in f32 (v5e has no bf16 VPU path).
    h = jnp.maximum(h + b1_ref[...], 0.0)
    # TODO(synk): training-mode dropout would use pltpu.prng_seed + pltpu.prng_random_bits;
    # eval-mode nn.Dropout is the identity, matching PyTorch .eval() semantics.
    out = jnp.dot(h.astype(jnp.bfloat16), w2_ref[...],
                  preferred_element_type=jnp.float32)
    o_ref[...] = (out + b2_ref[...]).astype(o_ref.dtype)


def prepare_params(w1, b1, w2, b2):
    """One-time parameter prep (hoisted out of the forward pass).

    w1: (D, H), b1: (1, H), w2: (H, C), b2: (1, C), all float32.
    Returns lane-padded bf16 weights and f32 biases ready for the kernel."""
    D, H = w1.shape
    C = w2.shape[1]
    Hp = _round_up(H, LANE)
    Cp = _round_up(C, LANE)
    b1 = jnp.asarray(b1, jnp.float32).reshape(1, H)
    b2 = jnp.asarray(b2, jnp.float32).reshape(1, C)
    w1p = jnp.zeros((D, Hp), jnp.bfloat16).at[:, :H].set(w1.astype(jnp.bfloat16))
    b1p = jnp.zeros((1, Hp), jnp.float32).at[:, :H].set(b1)
    w2p = jnp.zeros((Hp, Cp), jnp.bfloat16).at[:H, :C].set(w2.astype(jnp.bfloat16))
    b2p = jnp.zeros((1, Cp), jnp.float32).at[:, :C].set(b2)
    return w1p, b1p, w2p, b2p


def _choose_tb(B, block_b):
    # Tiny batches: a single full-extent tile (block dims == array dims is always legal).
    if B < 2 * SUBLANE:
        return B
    # Otherwise: sublane-aligned tile giving at least 2 grid steps, so the "parallel"
    # batch axis actually feeds both of v7x's TensorCores; capped at block_b.
    half = -(-B // 2)
    return min(block_b, _round_up(half, SUBLANE))


def _vmem_limit_bytes(TB, D, Hp, Cp):
    x_tiles = 2 * TB * D * 4               # f32 x tile, double-buffered
    weights = D * Hp * 2 + Hp * Cp * 2     # bf16, single-buffered (Buffered(1))
    biases = (Hp + Cp) * 4
    out_tiles = 2 * TB * Cp * 4            # f32 out tile, double-buffered
    interm = TB * (Hp * 4 + max(D, Hp) * 2 + Cp * 4)   # h, bf16 casts, pre-store
    need = int((x_tiles + weights + biases + out_tiles + interm) * 1.5) + (4 << 20)
    # Floor at 32 MiB (compiler scratch headroom), cap at v7x's 64 MiB physical VMEM.
    # If the cap is hit, shrink block_b instead of raising the limit.
    return max(min(need, 64 << 20), 32 << 20)


def neural_net_forward(x_nchw, w1p, b1p, w2p, b2p, num_classes, *, block_b=512):
    """x_nchw: (N, C, H, W) float32. w1p/b1p/w2p/b2p: outputs of prepare_params().

    Returns logits (N, num_classes) in float32."""
    B = x_nchw.shape[0]
    x2d = x_nchw.reshape(B, -1).astype(jnp.float32)    # nn.Flatten()
    D = x2d.shape[1]
    assert w1p.shape[0] == D, "prepared w1 does not match flattened input size"
    Hp = w1p.shape[1]
    Cp = w2p.shape[1]

    # TODO(synk): for very large D (> ~8-16K features) add a K-axis grid over D with an
    # f32 VMEM accumulator instead of loading the full (TB, D) tile and (D, Hp) w1.
    TB = _choose_tb(B, block_b)
    grid = (pl.cdiv(B, TB),)   # ragged last tile: OOB reads only feed OOB rows,
                               # whose writes Pallas masks.

    out_padded = pl.pallas_call(
        mlp_kernel,
        out_shape=jax.ShapeDtypeStruct((B, Cp), jnp.float32),
        grid_spec=pltpu.PrefetchScalarGridSpec(
            num_scalar_prefetch=0,
            grid=grid,
            in_specs=[
                # x: streamed batch tiles, full-D blocks (D == array dim, so no 128-pad needed)
                pl.BlockSpec((TB, D), lambda i: (i, 0)),
                # weights/biases: constant index_map -> resident; single-buffered to halve
                # their VMEM footprint.
                pl.BlockSpec((D, Hp), lambda i: (0, 0), pipeline_mode=pl.Buffered(1)),
                pl.BlockSpec((1, Hp), lambda i: (0, 0), pipeline_mode=pl.Buffered(1)),
                pl.BlockSpec((Hp, Cp), lambda i: (0, 0), pipeline_mode=pl.Buffered(1)),
                pl.BlockSpec((1, Cp), lambda i: (0, 0), pipeline_mode=pl.Buffered(1)),
            ],
            out_specs=pl.BlockSpec((TB, Cp), lambda i: (i, 0)),
        ),
        compiler_params=pltpu.CompilerParams(
            dimension_semantics=("parallel",),   # batch tiles independent -> megacore
            vmem_limit_bytes=_vmem_limit_bytes(TB, D, Hp, Cp),
        ),
    )(x2d, w1p, b1p, w2p, b2p)
    return out_padded[:, :num_classes]


def init_params(key, input_size, hidden_size, num_classes):
    """Deterministic init mirroring torch.nn.Linear default (U(-1/sqrt(fan_in), +1/sqrt(fan_in))).

    Weights are stored pre-transposed: w1 (D_in, H), w2 (H, C), so the kernel computes
    x @ W directly (equivalent to PyTorch's x @ W.T with W of shape (out, in))."""
    k1, k2, k3, k4 = jax.random.split(key, 4)
    bound1 = 1.0 / jnp.sqrt(jnp.float32(input_size))
    bound2 = 1.0 / jnp.sqrt(jnp.float32(hidden_size))
    w1 = jax.random.uniform(k1, (input_size, hidden_size), jnp.float32, -bound1, bound1)
    b1 = jax.random.uniform(k2, (1, hidden_size), jnp.float32, -bound1, bound1)
    w2 = jax.random.uniform(k3, (hidden_size, num_classes), jnp.float32, -bound2, bound2)
    b2 = jax.random.uniform(k4, (1, num_classes), jnp.float32, -bound2, bound2)
    return w1, b1, w2, b2


if __name__ == "__main__":
    # Small shapes consistent with the module: x (2, 4, 16, 16) -> input_size=1024.
    batch, chan, spatial = 2, 4, 16
    input_size = chan * spatial * spatial    # 1024
    hidden_size = 32
    num_classes = 10

    key = jax.random.PRNGKey(0)
    kx, kp = jax.random.split(key)
    x = jax.random.normal(kx, (batch, chan, spatial, spatial), jnp.float32)
    w1, b1, w2, b2 = init_params(kp, input_size, hidden_size, num_classes)

    # One-time weight prep (pad to lane multiples + cast to bf16), hoisted out of the
    # per-call forward path.
    w1p, b1p, w2p, b2p = prepare_params(w1, b1, w2, b2)

    out = neural_net_forward(x, w1p, b1p, w2p, b2p, num_classes)
    jax.block_until_ready(out)

    # Sanity-check against a pure-JAX f32 reference of the same forward pass.
    # (Tolerance loosened vs. an f32 kernel because matmul operands are bf16.)
    x2d = x.reshape(batch, -1)
    ref = jnp.maximum(x2d @ w1 + b1, 0.0) @ w2 + b2
    assert out.shape == (batch, num_classes)
    assert jnp.allclose(out, ref, atol=5e-2, rtol=5e-2), float(jnp.max(jnp.abs(out - ref)))

    print("KERNEL_OK")
</pallas_src>

<mosaic_0001>
module attributes {stable_mosaic.version = 11 : i64} {
  func.func @mlp_kernel(%arg0: i32, %arg1: memref<2x1024xf32, #tpu.memory_space<vmem>>, %arg2: memref<1024x128xbf16, #tpu.memory_space<vmem>>, %arg3: memref<1x128xf32, #tpu.memory_space<vmem>>, %arg4: memref<128x128xbf16, #tpu.memory_space<vmem>>, %arg5: memref<1x128xf32, #tpu.memory_space<vmem>>, %arg6: memref<2x128xf32, #tpu.memory_space<vmem>>) attributes {dimension_semantics = [#tpu.dimension_semantics<parallel>], iteration_bounds = array<i64: 1>, scalar_prefetch = 0 : i64, scratch_operands = 0 : i64, tpu.core_type = #tpu.core_type<tc>, window_params = [{transform_indices = @transform_0, window_bounds = array<i64: 2, 1024>}, {pipeline_mode = #tpu.pipeline_mode<synchronous>, transform_indices = @transform_1, window_bounds = array<i64: 1024, 128>}, {pipeline_mode = #tpu.pipeline_mode<synchronous>, transform_indices = @transform_2, window_bounds = array<i64: 1, 128>}, {pipeline_mode = #tpu.pipeline_mode<synchronous>, transform_indices = @transform_3, window_bounds = array<i64: 128, 128>}, {pipeline_mode = #tpu.pipeline_mode<synchronous>, transform_indices = @transform_4, window_bounds = array<i64: 1, 128>}, {transform_indices = @transform_5, window_bounds = array<i64: 2, 128>}]} {
    %c0 = arith.constant 0 : index
    %c0_0 = arith.constant 0 : index
    %0 = vector.load %arg1[%c0, %c0_0] : memref<2x1024xf32, #tpu.memory_space<vmem>>, vector<2x1024xf32>
    %1 = arith.truncf %0 : vector<2x1024xf32> to vector<2x1024xbf16>
    %c0_1 = arith.constant 0 : index
    %c0_2 = arith.constant 0 : index
    %2 = vector.load %arg2[%c0_1, %c0_2] : memref<1024x128xbf16, #tpu.memory_space<vmem>>, vector<1024x128xbf16>
    %cst = arith.constant dense<0.000000e+00> : vector<2x128xf32>
    %3 = tpu.matmul %1, %2, %cst {dimension_numbers = #tpu.dot_dimension_numbers<[1], [0], [0], [1], [0, 0, 1, 1], [], []>} : vector<2x1024xbf16>, vector<1024x128xbf16>, vector<2x128xf32> -> vector<2x128xf32>
    %c0_3 = arith.constant 0 : index
    %c0_4 = arith.constant 0 : index
    %4 = vector.load %arg3[%c0_3, %c0_4] : memref<1x128xf32, #tpu.memory_space<vmem>>, vector<1x128xf32>
    %5 = vector.broadcast %4 : vector<1x128xf32> to vector<2x128xf32>
    %6 = arith.addf %3, %5 : vector<2x128xf32>
    %cst_5 = arith.constant 0.000000e+00 : f32
    %7 = vector.broadcast %cst_5 : f32 to vector<2x128xf32>
    %8 = arith.maximumf %6, %7 : vector<2x128xf32>
    %9 = arith.truncf %8 : vector<2x128xf32> to vector<2x128xbf16>
    %c0_6 = arith.constant 0 : index
    %c0_7 = arith.constant 0 : index
    %10 = vector.load %arg4[%c0_6, %c0_7] : memref<128x128xbf16, #tpu.memory_space<vmem>>, vector<128x128xbf16>
    %cst_8 = arith.constant dense<0.000000e+00> : vector<2x128xf32>
    %11 = tpu.matmul %9, %10, %cst_8 {dimension_numbers = #tpu.dot_dimension_numbers<[1], [0], [0], [1], [0, 0, 1, 1], [], []>} : vector<2x128xbf16>, vector<128x128xbf16>, vector<2x128xf32> -> vector<2x128xf32>
    %c0_9 = arith.constant 0 : index
    %c0_10 = arith.constant 0 : index
    %12 = vector.load %arg5[%c0_9, %c0_10] : memref<1x128xf32, #tpu.memory_space<vmem>>, vector<1x128xf32>
    %13 = vector.broadcast %12 : vector<1x128xf32> to vector<2x128xf32>
    %14 = arith.addf %11, %13 : vector<2x128xf32>
    %c0_11 = arith.constant 0 : index
    %c0_12 = arith.constant 0 : index
    %15 = vector.load %arg6[%c0_11, %c0_12] : memref<2x128xf32, #tpu.memory_space<vmem>>, vector<2x128xf32>
    tpu.vector_store %arg6[%c0_11, %c0_12], %14 {strides = array<i32>} : memref<2x128xf32, #tpu.memory_space<vmem>>, vector<2x128xf32>,
    return
  }
  func.func @transform_0(%arg0: i32) -> (i32, i32) {
    %c0_i32 = arith.constant 0 : i32
    %c0_i32_0 = arith.constant 0 : i32
    return %arg0, %c0_i32 : i32, i32
  }
  func.func @transform_1(%arg0: i32) -> (i32, i32) {
    %c0_i32 = arith.constant 0 : i32
    %c0_i32_0 = arith.constant 0 : i32
    %c0_i32_1 = arith.constant 0 : i32
    return %c0_i32, %c0_i32_0 : i32, i32
  }
  func.func @transform_2(%arg0: i32) -> (i32, i32) {
    %c0_i32 = arith.constant 0 : i32
    %c0_i32_0 = arith.constant 0 : i32
    %c0_i32_1 = arith.constant 0 : i32
    return %c0_i32, %c0_i32_0 : i32, i32
  }
  func.func @transform_3(%arg0: i32) -> (i32, i32) {
    %c0_i32 = arith.constant 0 : i32
    %c0_i32_0 = arith.constant 0 : i32
    %c0_i32_1 = arith.constant 0 : i32
    return %c0_i32, %c0_i32_0 : i32, i32
  }
  func.func @transform_4(%arg0: i32) -> (i32, i32) {
    %c0_i32 = arith.constant 0 : i32
    %c0_i32_0 = arith.constant 0 : i32
    %c0_i32_1 = arith.constant 0 : i32
    return %c0_i32, %c0_i32_0 : i32, i32
  }
  func.func @transform_5(%arg0: i32) -> (i32, i32) {
    %c0_i32 = arith.constant 0 : i32
    %c0_i32_0 = arith.constant 0 : i32
    return %arg0, %c0_i32 : i32, i32
  }
}

</mosaic_0001>

<bundles_post_ra>
// kernel: tpu_custom_call.1
= control target key start
LH: loop header
LB: loop body
LE: loop exit
PB: predicated region body
PF: predicated region fallthrough
CT: control target
= control target key end

     0   :  { %10 = vsyncpa [#allocation3], 0  ;;  %s1347_s0 = inlined_call_operand.hbm [shape: f32[2,1024], index: 0, kind: input, shape index: {}]   ;;  %s1348_s1 = inlined_call_operand.hbm [shape: bf16[1024,128], index: 1, kind: input, shape index: {}]   ;;  %s1349_s2 = inlined_call_operand.vmem [shape: f32[1,128], index: 2, kind: input, shape index: {}]   ;;  %s1350_s3 = inlined_call_operand.hbm [shape: bf16[128,128], index: 3, kind: input, shape index: {}]   ;;  %s1351_s4 = inlined_call_operand.vmem [shape: f32[1,128], index: 4, kind: input, shape index: {}]   ;;  %s1352_s5 = inlined_call_operand.hbm [shape: f32[2,128], index: 5, kind: output, shape index: {}]  }
   0x1   :  { %11 = vsyncpa [#allocation6], 0 }
   0x2   :  { %12 = vsyncpa [#allocation4], 0  ;;  %s1284_s18 = smov [#allocation5]  }
   0x3   :  { %s28_s19 = sshll.u32 %s1284_s18, 4  ;;  %s29_s19 = int_to_ptr.vmem [resolvable:$true] %s28_s19 }
   0x4   :  { %s1206_s20 = scalar_lea.vmem %s29_s19, 8192  ;;  %p1211_p1 = scmp.lt.s32.totalorder %s29_s19, %s29_s19 }
   0x5   :  { %p1207_p0 = scmp.ne.s32.totalorder %s29_s19, %s1206_s20  ;;  %p1212_p2 = scmp.lt.s32.totalorder %s1206_s20, %s1206_s20 }
   0x7   :  { %p1213_p3 = por %p1212_p2, %p1211_p1 }
   0x9   :  { %p1214_p4 = pnand %p1213_p3, %p1207_p0 }
   0xb   :  { %1217 = shalt.err (!%p1214_p4)
}
   0xc   :  { %s1285_s21 = smov 64   ;;  %s1286_s22 = smov 4  }
   0xd   :  { %34 = dma.hbm_to_vmem [thread:$0]  %s1348_s1, 8192, %s29_s19, [#allocation6], %s1285_s21, %s1285_s21, %s1286_s22  }
   0xe   :  { %s1287_s25 = smov [#allocation2]   ;;  %s1288_s27 = smov [#allocation7]  }
   0xf   :  { %s19_s26 = sshll.u32 %s1287_s25, 4  ;;  %s42_s28 = sshll.u32 %s1288_s27, 4  ;;  %s20_s26 = int_to_ptr.vmem [resolvable:$true] %s19_s26  ;;  %s43_s28 = int_to_ptr.vmem [resolvable:$true] %s42_s28 }
  0x10   :  { %s1226_s29 = scalar_lea.vmem %s20_s26, 256  ;;  %p1231_p6 = scmp.lt.s32.totalorder %s20_s26, %s20_s26 }
  0x11   :  { %p1227_p5 = scmp.ne.s32.totalorder %s20_s26, %s1226_s29  ;;  %p1232_p7 = scmp.lt.s32.totalorder %s1226_s29, %s1226_s29 }
  0x13   :  { %p1233_p8 = por %p1232_p7, %p1231_p6 }
  0x15   :  { %p1234_p9 = pnand %p1233_p8, %p1227_p5 }
  0x17   :  { %1237 = shalt.err (!%p1234_p9)
}
  0x18   :  { %22 = dma.hbm_to_vmem [thread:$0]  %s1347_s0, 256, %s20_s26, [#allocation3]  }
  0x19   :  { %s1246_s7 = scalar_lea.vmem %s43_s28, 1024  ;;  %p1251_p11 = scmp.lt.s32.totalorder %s43_s28, %s43_s28 }
  0x1a   :  { %p1247_p10 = scmp.ne.s32.totalorder %s43_s28, %s1246_s7  ;;  %p1252_p12 = scmp.lt.s32.totalorder %s1246_s7, %s1246_s7 }
  0x1c   :  { %p1253_p13 = por %p1252_p12, %p1251_p11 }
  0x1e   :  { %p1254_p0 = pnand %p1253_p13, %p1247_p10 }
  0x20   :  { %1257 = shalt.err (!%p1254_p0)
}
  0x21   :  { %48 = dma.hbm_to_vmem [thread:$0]  %s1350_s3, 1024, %s43_s28, [#allocation6], %s1285_s21, %s1285_s21, %s1286_s22  }
  0x22   :  { %1278 = dma.done.wait [#allocation3], 256  }
  0x23   :  { %1279 = vsyncadd [#allocation3], 4294967040 }
  0x24   :  { %1280 = dma.done.wait [#allocation6], 9216  }
  0x25   :  { %1281 = vsyncadd [#allocation6], 4294958080  ;;  %v1124_v0 = vld [vmem:[#allocation5 + $0x78] sm:$0xff]   ;;  %v1128_v4 = vld [vmem:[#allocation5 + $0x70] sm:$0xff]   ;;  %v1289_v22 = vmov 1983009808   ;;  %v69_v24 = vlaneseq }
  0x26   :  { %v1125_v1 = vld [vmem:[#allocation5 + $0xf8] sm:$0xff]   ;;  %998 = vmatprep.subr.bf16.mxu0 %v1124_v0  ;;  %v1129_v5 = vld [vmem:[#allocation5 + $0xf0] sm:$0xff]   ;;  %v1132_v8 = vld [vmem:[#allocation5 + $0x68] sm:$0xff]   ;;  %v67_v23 = vunpack.c.l.s4 %v1289_v22  ;;  %vm1291_vm0 = vmmov 0   ;;  %s1292_s10 = smov [#allocation8]  }
  0x27   :  { %v1126_v2 = vld [vmem:[#allocation5 + $0x38] sm:$0xff]   ;;  %1020 = vmatprep.subr.bf16.mxu1 %v1125_v1  ;;  %v1130_v6 = vld [vmem:[#allocation5 + $0x30] sm:$0xff]   ;;  %v1133_v9 = vld [vmem:[#allocation5 + $0xe8] sm:$0xff]   ;;  %v70_v30 = vshrl.u32 %v69_v24, 7  ;;  %s914_s11 = sshll.u32 %s1292_s10, 4  ;;  %s915_s11 = int_to_ptr.vmem [resolvable:$true] %s914_s11 }
  0x28   :  { %v1127_v3 = vld [vmem:[#allocation5 + $0xb8] sm:$0xff]   ;;  %999 = vmatpush3.bf16.msra.mxu0 %v1126_v2  ;;  %v1131_v7 = vld [vmem:[#allocation5 + $0xb0] sm:$0xff]   ;;  %v1134_v10 = vld [vmem:[#allocation5 + $0x28] sm:$0xff]   ;;  %v68_v29 = vunpack.c.0.s8 %v67_v23  ;;  %s1258_s12 = scalar_lea.vmem %s915_s11, 32  ;;  %p1263_p2 = scmp.lt.s32.totalorder %s915_s11, %s915_s11 }
  0x29   :  { %1021 = vmatpush3.bf16.msra.mxu1 %v1127_v3  ;;  %1000 = vmatprep.subr.bf16.mxu0 %v1128_v4  ;;  %v1135_v11 = vld [vmem:[#allocation5 + $0xa8] sm:$0xff]   ;;  %v1136_v12 = vld [vmem:[#allocation5 + $0x60] sm:$0xff]   ;;  %v1140_v16 = vld [vmem:[#allocation5 + $0x58] sm:$0xff]   ;;  %p1259_p1 = scmp.ne.s32.totalorder %s915_s11, %s1258_s12  ;;  %p1264_p3 = scmp.lt.s32.totalorder %s1258_s12, %s1258_s12 }
  0x2a   :  { %1022 = vmatprep.subr.bf16.mxu1 %v1129_v5  ;;  %v1137_v13 = vld [vmem:[#allocation5 + $0xe0] sm:$0xff]   ;;  %v1141_v17 = vld [vmem:[#allocation5 + $0xd8] sm:$0xff]   ;;  %v1144_v20 = vld [vmem:[#allocation5 + $0x50] sm:$0xff]   ;;  %v1332_v35 = vsub.s32 %v68_v29, %v70_v30 }
  0x2b   :  { %v1138_v14 = vld [vmem:[#allocation5 + $0x20] sm:$0xff]   ;;  %v1142_v18 = vld [vmem:[#allocation5 + $0x18] sm:$0xff]   ;;  %v1145_v21 = vld [vmem:[#allocation5 + $0xd0] sm:$0xff]   ;;  %p1265_p4 = por %p1264_p3, %p1263_p2 }
  0x2c   :  { %1001 = vmatpush3.bf16.msra.mxu0 %v1130_v6  ;;  %v1139_v15 = vld [vmem:[#allocation5 + $0xa0] sm:$0xff]   ;;  %v1143_v19 = vld [vmem:[#allocation5 + $0x98] sm:$0xff]   ;;  %v1146_v25 = vld [vmem:[#allocation5 + $0x10] sm:$0xff]  }
  0x2d   :  { %1023 = vmatpush3.bf16.msra.mxu1 %v1131_v7  ;;  %1002 = vmatprep.subr.bf16.mxu0 %v1132_v8  ;;  %v1147_v26 = vld [vmem:[#allocation5 + $0x90] sm:$0xff]   ;;  %v1148_v27 = vld [vmem:[#allocation5 + $0x48] sm:$0xff]   ;;  %v1152_v33 = vld [vmem:[#allocation5 + $0x40] sm:$0xff]   ;;  %p1266_p5 = pnand %p1265_p4, %p1259_p1 }
  0x2e   :  { %1024 = vmatprep.subr.bf16.mxu1 %v1133_v9  ;;  %v1149_v28 = vld [vmem:[#allocation5 + $0xc8] sm:$0xff]   ;;  %v1153_v34 = vld [vmem:[#allocation5 + $0xc0] sm:$0xff]   ;;  %v61_v38 = vld [vmem:[#allocation2] sm:$0xff] }
  0x2f   :  { %v1150_v31 = vld [vmem:[#allocation5 + $0x8] sm:$0xff]   ;;  %v1154_v36 = vld [vmem:[#allocation5] sm:$0xff]   ;;  %v72_v39 = vrot.slane %v61_v38, %v1332_v35  ;;  %v65_v40 = vcombine.high %v61_v38, %v61_v38  ;;  %v1157_v41 = vld [vmem:[#allocation5 + $0x178] sm:$0xff]  }
  0x30   :  { %1003 = vmatpush3.bf16.msra.mxu0 %v1134_v10  ;;  %v1151_v32 = vld [vmem:[#allocation5 + $0x88] sm:$0xff]   ;;  %v1155_v37 = vld [vmem:[#allocation5 + $0x80] sm:$0xff]   ;;  %v1158_v42 = vld [vmem:[#allocation5 + $0x1f8] sm:$0xff]  }
  0x31   :  { %1025 = vmatpush3.bf16.msra.mxu1 %v1135_v11  ;;  %1004 = vmatprep.subr.bf16.mxu0 %v1136_v12  ;;  %v80_v43 = vcombine.high %v72_v39, %v72_v39  ;;  %v79_v44 = vrot.slane %v65_v40, %v1332_v35  ;;  %v107_v45 = vpack.c.bf16 %v72_v39, %v72_v39  ;;  %v1159_v46 = vld [vmem:[#allocation5 + $0x138] sm:$0xff]   ;;  %v1161_v51 = vld [vmem:[#allocation5 + $0x170] sm:$0xff]   ;;  %v1165_v56 = vld [vmem:[#allocation5 + $0x168] sm:$0xff]  }
  0x32   :  { %1026 = vmatprep.subr.bf16.mxu1 %v1137_v13  ;;  %v1160_v49 = vld [vmem:[#allocation5 + $0x1b8] sm:$0xff]   ;;  %v1162_v53 = vld [vmem:[#allocation5 + $0x1f0] sm:$0xff]   ;;  %v1166_v57 = vld [vmem:[#allocation5 + $0x1e8] sm:$0xff]  }
  0x33   :  { %v108_v47 = vpack.c.bf16 %v80_v43, %v80_v43  ;;  %v81_v48 = vcombine.high %v79_v44, %v79_v44  ;;  %v109_v50 = vpack.c.bf16 %v79_v44, %v79_v44  ;;  %v1163_v54 = vld [vmem:[#allocation5 + $0x130] sm:$0xff]   ;;  %v1167_v58 = vld [vmem:[#allocation5 + $0x128] sm:$0xff]   ;;  %v1169_v60 = vld [vmem:[#allocation5 + $0x160] sm:$0xff]  }
  0x34   :  { %1005 = vmatpush3.bf16.msra.mxu0 %v1138_v14  ;;  %v1164_v55 = vld [vmem:[#allocation5 + $0x1b0] sm:$0xff]   ;;  %v1168_v59 = vld [vmem:[#allocation5 + $0x1a8] sm:$0xff]   ;;  %v1170_v61 = vld [vmem:[#allocation5 + $0x1e0] sm:$0xff]  }
  0x35   :  { %1027 = vmatpush3.bf16.msra.mxu1 %v1139_v15  ;;  %1006 = vmatprep.subr.bf16.mxu0 %v1140_v16  ;;  %v110_v52 = vpack.c.bf16 %v81_v48, %v81_v48  ;;  %v1171_v62 = vld [vmem:[#allocation5 + $0x120] sm:$0xff]   ;;  %v1173_v0 = vld [vmem:[#allocation5 + $0x158] sm:$0xff]   ;;  %v1177_v4 = vld [vmem:[#allocation5 + $0x150] sm:$0xff]  }
  0x36   :  { %1028 = vmatprep.subr.bf16.mxu1 %v1141_v17  ;;  %666 = vmatprep.mubr.bf16.mxu0 %v108_v47  ;;  %v1172_v63 = vld [vmem:[#allocation5 + $0x1a0] sm:$0xff]   ;;  %v1174_v1 = vld [vmem:[#allocation5 + $0x1d8] sm:$0xff]   ;;  %v1178_v5 = vld [vmem:[#allocation5 + $0x1d0] sm:$0xff]  }
  0x37   :  { %706 = vmatprep.mubr.bf16.mxu1 %v110_v52  ;;  %v1175_v2 = vld [vmem:[#allocation5 + $0x118] sm:$0xff]   ;;  %v1179_v6 = vld [vmem:[#allocation5 + $0x110] sm:$0xff]   ;;  %v1181_v8 = vld [vmem:[#allocation5 + $0x148] sm:$0xff]  }
  0x38   :  { %1007 = vmatpush3.bf16.msra.mxu0 %v1142_v18  ;;  %v1176_v3 = vld [vmem:[#allocation5 + $0x198] sm:$0xff]   ;;  %v1180_v7 = vld [vmem:[#allocation5 + $0x190] sm:$0xff]   ;;  %v1182_v9 = vld [vmem:[#allocation5 + $0x1c8] sm:$0xff]  }
  0x39   :  { %1029 = vmatpush3.bf16.msra.mxu1 %v1143_v19  ;;  %1008 = vmatprep.subr.bf16.mxu0 %v1144_v20  ;;  %v1183_v10 = vld [vmem:[#allocation5 + $0x108] sm:$0xff]   ;;  %v1185_v12 = vld [vmem:[#allocation5 + $0x140] sm:$0xff]   ;;  %v62_v15 = vld [vmem:[#allocation2 + $0x8] sm:$0xff] }
  0x3a   :  { %1030 = vmatprep.subr.bf16.mxu1 %v1145_v21  ;;  %v1184_v11 = vld [vmem:[#allocation5 + $0x188] sm:$0xff]   ;;  %v1186_v13 = vld [vmem:[#allocation5 + $0x1c0] sm:$0xff]   ;;  %v89_v17 = vrot.slane %v62_v15, %v1332_v35  ;;  %v82_v18 = vcombine.high %v62_v15, %v62_v15  ;;  %v924_v44 = vld [vmem:[%s1349_s2] ss:$0 sm:$0xff] }
  0x3b   :  { %v1187_v14 = vld [vmem:[#allocation5 + $0x100] sm:$0xff]   ;;  %v1192_v29 = vld [vmem:[#allocation7 + $0x28] sm:$0xff]  }
  0x3c   :  { %1009 = vmatpush3.bf16.msra.mxu0 %v1146_v25  ;;  %v1188_v16 = vld [vmem:[#allocation5 + $0x180] sm:$0xff]   ;;  %v97_v19 = vcombine.high %v89_v17, %v89_v17  ;;  %v96_v20 = vrot.slane %v82_v18, %v1332_v35  ;;  %v111_v21 = vpack.c.bf16 %v89_v17, %v89_v17 }
  0x3d   :  { %1031 = vmatpush3.bf16.msra.mxu1 %v1147_v26  ;;  %1010 = vmatprep.subr.bf16.mxu0 %v1148_v27  ;;  %v1190_v26 = vld [vmem:[#allocation7 + $0x38] sm:$0xff]   ;;  %v1290_v27 = vmov 0.0   ;;  %v1193_v30 = vld [vmem:[#allocation7 + $0x20] sm:$0xff]  }
  0x3e   :  { %1032 = vmatprep.subr.bf16.mxu1 %v1149_v28  ;;  %v112_v22 = vpack.c.bf16 %v97_v19, %v97_v19  ;;  %v98_v23 = vcombine.high %v96_v20, %v96_v20  ;;  %v113_v24 = vpack.c.bf16 %v96_v20, %v96_v20  ;;  %v1191_v28 = vld [vmem:[#allocation7 + $0x30] sm:$0xff]  }
  0x40   :  { %1011 = vmatpush3.bf16.msra.mxu0 %v1150_v31  ;;  %v114_v25 = vpack.c.bf16 %v98_v23, %v98_v23  ;;  %v1194_v31 = vld [vmem:[#allocation7 + $0x18] sm:$0xff]  }
  0x41   :  { %1033 = vmatpush3.bf16.msra.mxu1 %v1151_v32  ;;  %1012 = vmatprep.subr.bf16.mxu0 %v1152_v33  ;;  %v1195_v32 = vld [vmem:[#allocation7 + $0x10] sm:$0xff]   ;;  %v1196_v33 = vld [vmem:[#allocation7 + $0x8] sm:$0xff]  }
  0x42   :  { %1034 = vmatprep.subr.bf16.mxu1 %v1153_v34  ;;  %v1197_v34 = vld [vmem:[#allocation7] sm:$0xff]  }
  0x44   :  { %1013 = vmatpush3.bf16.msra.mxu0 %v1154_v36 }
  0x45   :  { %1035 = vmatpush3.bf16.msra.mxu1 %v1155_v37  ;;  %1042 = vmatprep.subr.bf16.mxu0 %v1157_v41 }
  0x46   :  { %1064 = vmatprep.subr.bf16.mxu1 %v1158_v42 }
  0x47   :  { %667 = vmatmul.mubr.bf16.vlgmr.msra.gmra.mxu0 %v107_v45 }
  0x48   :  { %1043 = vmatpush3.bf16.msra.mxu0 %v1159_v46  ;;  %707 = vmatmul.mubr.bf16.vlgmr.msra.gmra.mxu1 %v109_v50 }
  0x49   :  { %1044 = vmatprep.subr.bf16.mxu0 %v1161_v51  ;;  %1065 = vmatpush3.bf16.msra.mxu1 %v1160_v49 }
  0x4a   :  { %1066 = vmatprep.subr.bf16.mxu1 %v1162_v53  ;;  %746 = vmatprep.mubr.bf16.mxu0 %v112_v22 }
  0x4b   :  { %786 = vmatprep.mubr.bf16.mxu1 %v114_v25 }
  0x4c   :  { %1045 = vmatpush3.bf16.msra.mxu0 %v1163_v54 }
  0x4d   :  { %1046 = vmatprep.subr.bf16.mxu0 %v1165_v56  ;;  %1067 = vmatpush3.bf16.msra.mxu1 %v1164_v55 }
  0x4e   :  { %1068 = vmatprep.subr.bf16.mxu1 %v1166_v57 }
  0x50   :  { %1047 = vmatpush3.bf16.msra.mxu0 %v1167_v58 }
  0x51   :  { %1048 = vmatprep.subr.bf16.mxu0 %v1169_v60  ;;  %1069 = vmatpush3.bf16.msra.mxu1 %v1168_v59 }
  0x52   :  { %1070 = vmatprep.subr.bf16.mxu1 %v1170_v61 }
  0x54   :  { %1049 = vmatpush3.bf16.msra.mxu0 %v1171_v62  ;;  %v989_v62 = vld [vmem:[%s1351_s4] ss:$0 sm:$0xff] }
  0x55   :  { %1050 = vmatprep.subr.bf16.mxu0 %v1173_v0  ;;  %1071 = vmatpush3.bf16.msra.mxu1 %v1172_v63 }
  0x56   :  { %1072 = vmatprep.subr.bf16.mxu1 %v1174_v1 }
  0x58   :  { %1051 = vmatpush3.bf16.msra.mxu0 %v1175_v2 }
  0x59   :  { %1052 = vmatprep.subr.bf16.mxu0 %v1177_v4  ;;  %1073 = vmatpush3.bf16.msra.mxu1 %v1176_v3 }
  0x5a   :  { %1074 = vmatprep.subr.bf16.mxu1 %v1178_v5 }
  0x5c   :  { %1053 = vmatpush3.bf16.msra.mxu0 %v1179_v6 }
  0x5d   :  { %1054 = vmatprep.subr.bf16.mxu0 %v1181_v8  ;;  %1075 = vmatpush3.bf16.msra.mxu1 %v1180_v7 }
  0x5e   :  { %1076 = vmatprep.subr.bf16.mxu1 %v1182_v9 }
  0x60   :  { %1055 = vmatpush3.bf16.msra.mxu0 %v1183_v10 }
  0x61   :  { %1056 = vmatprep.subr.bf16.mxu0 %v1185_v12  ;;  %1077 = vmatpush3.bf16.msra.mxu1 %v1184_v11 }
  0x62   :  { %1078 = vmatprep.subr.bf16.mxu1 %v1186_v13 }
  0x64   :  { %1057 = vmatpush3.bf16.msra.mxu0 %v1187_v14 }
  0x65   :  { %1079 = vmatpush3.bf16.msra.mxu1 %v1188_v16  ;;  %1095 = vmatprep.subr.bf16.mxu0 %v1290_v27 }
  0x67   :  { %747 = vmatmul.mubr.bf16.vlgmr.msra.gmra.mxu0 %v111_v21 }
  0x68   :  { %787 = vmatmul.mubr.bf16.vlgmr.msra.gmra.mxu1 %v113_v24  ;;  %1096 = vmatpush3.bf16.msra.mxu0 %v1190_v26 }
  0x69   :  { %1097 = vmatprep.subr.bf16.mxu0 %v1290_v27  ;;  %1111 = vmatprep.mubr.msk.bf16.mxu0 %vm1291_vm0, %v1290_v27 }
  0x6c   :  { %1098 = vmatpush3.bf16.msra.mxu0 %v1191_v28 }
  0x6d   :  { %1099 = vmatprep.subr.bf16.mxu0 %v1290_v27 }
  0x70   :  { %1100 = vmatpush3.bf16.msra.mxu0 %v1192_v29 }
  0x71   :  { %1101 = vmatprep.subr.bf16.mxu0 %v1290_v27 }
  0x74   :  { %1102 = vmatpush3.bf16.msra.mxu0 %v1193_v30 }
  0x75   :  { %1103 = vmatprep.subr.bf16.mxu0 %v1290_v27 }
  0x78   :  { %1104 = vmatpush3.bf16.msra.mxu0 %v1194_v31 }
  0x79   :  { %1105 = vmatprep.subr.bf16.mxu0 %v1290_v27 }
  0x7c   :  { %1106 = vmatpush3.bf16.msra.mxu0 %v1195_v32 }
  0x7d   :  { %1107 = vmatprep.subr.bf16.mxu0 %v1290_v27 }
  0x80   :  { %1108 = vmatpush3.bf16.msra.mxu0 %v1196_v33 }
  0x81   :  { %1109 = vmatprep.subr.bf16.mxu0 %v1290_v27 }
  0x84   :  { %1110 = vmatpush3.bf16.msra.mxu0 %v1197_v34 }
 0x107   :  { %v1014_v35 = vpop.f32.mrf.mxu0 }
 0x108   :  { %v1036_v36 = vpop.f32.mrf.mxu1 }
 0x109   :  { %v1015_v37 = vpop.f32.mrf.mxu0 }
 0x10a   :  { %v1037_v38 = vpop.f32.mrf.mxu1  ;;  %v1016_v43 = vadd.f32 %v1015_v37, %v1014_v35 }
 0x10b   :  { %v1017_v39 = vpop.f32.mrf.mxu0  ;;  %v1038_v46 = vadd.f32 %v1037_v38, %v1036_v36 }
 0x10c   :  { %v1039_v40 = vpop.f32.mrf.mxu1  ;;  %v669_v45 = vadd.f32 %v1016_v43, %v924_v44 }
 0x10d   :  { %v1018_v41 = vpop.f32.mrf.mxu0 }
 0x10e   :  { %v1040_v42 = vpop.f32.mrf.mxu1  ;;  %v709_v50 = vadd.f32 %v1038_v46, %v669_v45 }
 0x127   :  { %v1058_v47 = vpop.f32.mrf.mxu0 }
 0x128   :  { %v1080_v48 = vpop.f32.mrf.mxu1 }
 0x129   :  { %v1059_v49 = vpop.f32.mrf.mxu0 }
 0x12a   :  { %v1060_v51 = vadd.f32 %v1059_v49, %v1058_v47  ;;  %v1081_v52 = vpop.f32.mrf.mxu1 }
 0x12b   :  { %v1061_v53 = vpop.f32.mrf.mxu0  ;;  %v1082_v55 = vadd.f32 %v1081_v52, %v1080_v48 }
 0x12c   :  { %v749_v54 = vadd.f32 %v1060_v51, %v709_v50  ;;  %v1083_v56 = vpop.f32.mrf.mxu1 }
 0x12d   :  { %v1062_v57 = vpop.f32.mrf.mxu0 }
 0x12e   :  { %v789_v58 = vadd.f32 %v1082_v55, %v749_v54  ;;  %v1084_v59 = vpop.f32.mrf.mxu1 }
 0x130   :  { %v794_v60 = vmax.f32 %v789_v58, 0.0 }
 0x132   :  { %v795_v61 = vpack.c.bf16 %v794_v60, %v794_v60 }
 0x134   :  { %1112 = vmatmul.mubr.bf16.vlgmr.msra.gmra.mxu0 %v795_v61 }
 0x1f4   :  { %v901_v63 = vpop.f32.mrf.mxu0 }
 0x1f5   :  { %v902_v0 = vadd.f32 %v989_v62, %v901_v63 }
 0x1f6   :  { %v1113_v1 = vpop.f32.mrf.mxu0 }
 0x1f7   :  { %907 = vst [vmem:[#allocation8] sm:$0x3] %v902_v0 }
 0x1f8   :  { %v904_v2 = vpop.f32.mrf.mxu0 }
 0x1f9   :  { %1269 = shalt.err (!%p1266_p5)
}
 0x1fa   :  { %917 = dma.vmem_to_hbm [thread:$0]  %s915_s11, 32, %s1352_s5, [#allocation4]   ;;  %v1114_v3 = vpop.f32.mrf.mxu0 }
 0x1fb   :  { %1282 = dma.done.wait [#allocation4], 32  }
 0x1fc   :  { %1283 = vsyncadd [#allocation4], 4294967264 }
 0x1fd   :  { %921 = vsyncpa [#allocation3], 1 }
 0x1fe   :  { %922 = vsyncpa [#allocation6], 1 }
 0x1ff   :  { %923 = vsyncpa [#allocation4], 1 }

</bundles_post_ra>
